<compile_context>
chip_gen: v7x
topology: tpu7x:2x2x1
jax: 0.10.0
libtpu: 0.0.40
codegen_flags: <defaults>
</compile_context>

<pallas_src>
import math

import jax
import jax.numpy as jnp
from jax.experimental import pallas as pl
from jax.experimental.pallas import tpu as pltpu

SIGMA_1 = 0.02
LOG_SIGMA_1 = math.log(SIGMA_1)


def _bayesian_flow_kernel(alpha_ref, std_ref, data_ref, noise_ref, mean_ref):
    """One grid step == TB samples.

    alpha_ref : VMEM (TB, 1)  -- per-sample alpha_t = 1 - sigma_1**(2t)
    std_ref   : VMEM (TB, 1)  -- per-sample sqrt(alpha_t * (1 - alpha_t))
    data_ref  : VMEM (TB, F)  -- flattened data rows
    noise_ref : VMEM (TB, F)  -- flattened standard-normal noise rows
    mean_ref  : VMEM (TB, F)  -- output: Bayesian-flow posterior mean sample
    """
    mean_ref[...] = (
        alpha_ref[...] * data_ref[...] + std_ref[...] * noise_ref[...]
    )


def bayesian_flow_forward(data, t, noise, *, tb_max=512):
    """data: (B, C, H, W) f32, t: (B,) f32, noise: (B, C, H, W) f32.

    Returns (mean, precision) with precision=None (unused by the net), matching
    the continuous BayesianFlow.forward semantics.
    """
    B, C, H, W = data.shape
    F = C * H * W

    data2 = data.reshape(B, F).astype(jnp.float32)
    noise2 = noise.reshape(B, F).astype(jnp.float32)
    t32 = t.astype(jnp.float32)

    # Hoist per-sample transcendentals out of the kernel (EUP work -> wrapper).
    post_var = jnp.exp(2.0 * t32 * LOG_SIGMA_1)        # sigma_1 ** (2 t)
    alpha_t = 1.0 - post_var
    std = jnp.sqrt(alpha_t * post_var)
    alpha_col = alpha_t.reshape(B, 1)
    std_col = std.reshape(B, 1)

    # Row-tile size: full batch when small (block == full extent is always
    # legal), otherwise 512 rows (multiple of 8; double-buffered footprint
    # ~12.6 MiB fits the default scoped VMEM on v5e/v6e/v7x).
    TB = B if B <= tb_max else tb_max
    grid = (pl.cdiv(B, TB),)

    row_spec = pl.BlockSpec((TB, F), lambda i: (i, 0))
    col_spec = pl.BlockSpec((TB, 1), lambda i: (i, 0))

    mean2 = pl.pallas_call(
        _bayesian_flow_kernel,
        out_shape=jax.ShapeDtypeStruct((B, F), jnp.float32),
        grid=grid,
        in_specs=[col_spec, col_spec, row_spec, row_spec],
        out_specs=row_spec,
        compiler_params=pltpu.CompilerParams(
            dimension_semantics=("parallel",),
        ),
    )(alpha_col, std_col, data2, noise2)

    mean = mean2.reshape(B, C, H, W)
    # TODO(synk): precision is unused by the net (None), as in the BFN reference.
    return mean, None


if __name__ == "__main__":
    key = jax.random.PRNGKey(0)
    k_data, k_t, k_noise = jax.random.split(key, 3)

    B, C, H, W = 2, 4, 16, 16
    data = jax.random.normal(k_data, (B, C, H, W), dtype=jnp.float32)
    t = jax.random.uniform(k_t, (B,), dtype=jnp.float32)
    noise = jax.random.normal(k_noise, (B, C, H, W), dtype=jnp.float32)

    mean, _ = bayesian_flow_forward(data, t, noise)
    mean = jax.block_until_ready(mean)

    # Plain-JAX reference check.
    post_var = jnp.power(SIGMA_1, 2.0 * t)[:, None, None, None]
    alpha_t = 1.0 - post_var
    ref = alpha_t * data + jnp.sqrt(alpha_t * post_var) * noise
    assert jnp.allclose(mean, ref, atol=1e-5, rtol=1e-5), "mismatch vs reference"

    print("KERNEL_OK")
</pallas_src>

<mosaic_0001>
module attributes {stable_mosaic.version = 11 : i64} {
  func.func @_bayesian_flow_kernel(%arg0: i32, %arg1: memref<2x1xf32, #tpu.memory_space<vmem>>, %arg2: memref<2x1xf32, #tpu.memory_space<vmem>>, %arg3: memref<2x1024xf32, #tpu.memory_space<vmem>>, %arg4: memref<2x1024xf32, #tpu.memory_space<vmem>>, %arg5: memref<2x1024xf32, #tpu.memory_space<vmem>>) attributes {dimension_semantics = [#tpu.dimension_semantics<parallel>], iteration_bounds = array<i64: 1>, scalar_prefetch = 0 : i64, scratch_operands = 0 : i64, tpu.core_type = #tpu.core_type<tc>, window_params = [{transform_indices = @transform_0, window_bounds = array<i64: 2, 1>}, {transform_indices = @transform_1, window_bounds = array<i64: 2, 1>}, {transform_indices = @transform_2, window_bounds = array<i64: 2, 1024>}, {transform_indices = @transform_3, window_bounds = array<i64: 2, 1024>}, {transform_indices = @transform_4, window_bounds = array<i64: 2, 1024>}]} {
    %c0 = arith.constant 0 : index
    %c0_0 = arith.constant 0 : index
    %0 = vector.load %arg1[%c0, %c0_0] : memref<2x1xf32, #tpu.memory_space<vmem>>, vector<2x1xf32>
    %c0_1 = arith.constant 0 : index
    %c0_2 = arith.constant 0 : index
    %1 = vector.load %arg3[%c0_1, %c0_2] : memref<2x1024xf32, #tpu.memory_space<vmem>>, vector<2x1024xf32>
    %2 = vector.broadcast %0 : vector<2x1xf32> to vector<2x1024xf32>
    %3 = arith.mulf %2, %1 : vector<2x1024xf32>
    %c0_3 = arith.constant 0 : index
    %c0_4 = arith.constant 0 : index
    %4 = vector.load %arg2[%c0_3, %c0_4] : memref<2x1xf32, #tpu.memory_space<vmem>>, vector<2x1xf32>
    %c0_5 = arith.constant 0 : index
    %c0_6 = arith.constant 0 : index
    %5 = vector.load %arg4[%c0_5, %c0_6] : memref<2x1024xf32, #tpu.memory_space<vmem>>, vector<2x1024xf32>
    %6 = vector.broadcast %4 : vector<2x1xf32> to vector<2x1024xf32>
    %7 = arith.mulf %6, %5 : vector<2x1024xf32>
    %8 = arith.addf %3, %7 : vector<2x1024xf32>
    %c0_7 = arith.constant 0 : index
    %c0_8 = arith.constant 0 : index
    %9 = vector.load %arg5[%c0_7, %c0_8] : memref<2x1024xf32, #tpu.memory_space<vmem>>, vector<2x1024xf32>
    tpu.vector_store %arg5[%c0_7, %c0_8], %8 {strides = array<i32>} : memref<2x1024xf32, #tpu.memory_space<vmem>>, vector<2x1024xf32>,
    return
  }
  func.func @transform_0(%arg0: i32) -> (i32, i32) {
    %c0_i32 = arith.constant 0 : i32
    %c0_i32_0 = arith.constant 0 : i32
    return %arg0, %c0_i32 : i32, i32
  }
  func.func @transform_1(%arg0: i32) -> (i32, i32) {
    %c0_i32 = arith.constant 0 : i32
    %c0_i32_0 = arith.constant 0 : i32
    return %arg0, %c0_i32 : i32, i32
  }
  func.func @transform_2(%arg0: i32) -> (i32, i32) {
    %c0_i32 = arith.constant 0 : i32
    %c0_i32_0 = arith.constant 0 : i32
    return %arg0, %c0_i32 : i32, i32
  }
  func.func @transform_3(%arg0: i32) -> (i32, i32) {
    %c0_i32 = arith.constant 0 : i32
    %c0_i32_0 = arith.constant 0 : i32
    return %arg0, %c0_i32 : i32, i32
  }
  func.func @transform_4(%arg0: i32) -> (i32, i32) {
    %c0_i32 = arith.constant 0 : i32
    %c0_i32_0 = arith.constant 0 : i32
    return %arg0, %c0_i32 : i32, i32
  }
}

</mosaic_0001>

<bundles_post_ra>
// kernel: tpu_custom_call.1
= control target key start
LH: loop header
LB: loop body
LE: loop exit
PB: predicated region body
PF: predicated region fallthrough
CT: control target
= control target key end

     0   :  { %9 = vsyncpa [#allocation3], 0  ;;  %s341_s0 = inlined_call_operand.vmem [shape: f32[2,1], index: 0, kind: input, shape index: {}]   ;;  %s342_s1 = inlined_call_operand.vmem [shape: f32[2,1], index: 1, kind: input, shape index: {}]   ;;  %s343_s2 = inlined_call_operand.hbm [shape: f32[2,1024], index: 2, kind: input, shape index: {}]   ;;  %s344_s3 = inlined_call_operand.vmem [shape: f32[2,1024], index: 3, kind: input, shape index: {}]   ;;  %s345_s4 = inlined_call_operand.hbm [shape: f32[2,1024], index: 4, kind: output, shape index: {}]  }
   0x1   :  { %10 = vsyncpa [#allocation4], 0  ;;  %s276_s15 = smov [#allocation2]   ;;  %s228_s19 = scalar_lea.hbm %s343_s2, 256 }
   0x2   :  { %s21_s16 = sshll.u32 %s276_s15, 4  ;;  %p229_p0 = scmp.ne.s32.totalorder %s343_s2, %s228_s19  ;;  %s22_s16 = int_to_ptr.vmem [resolvable:$true] %s21_s16 }
   0x3   :  { %p232_p1 = scmp.lt.u32.totalorder %s228_s19, %s343_s2 }
   0x5   :  { %p234_p2 = pnand %p232_p1, %p229_p0 }
   0x7   :  { %237 = shalt.err (!%p234_p2)
}
   0x8   :  { %s238_s24 = scalar_lea.vmem %s22_s16, 256  ;;  %p243_p4 = scmp.lt.s32.totalorder %s22_s16, %s22_s16 }
   0x9   :  { %p239_p3 = scmp.ne.s32.totalorder %s22_s16, %s238_s24  ;;  %p244_p5 = scmp.lt.s32.totalorder %s238_s24, %s238_s24 }
   0xb   :  { %p245_p6 = por %p244_p5, %p243_p4 }
   0xd   :  { %p246_p7 = pnand %p245_p6, %p239_p3 }
   0xf   :  { %249 = shalt.err (!%p246_p7)
}
  0x10   :  { %24 = dma.hbm_to_vmem [thread:$0]  %s343_s2, 256, %s22_s16, [#allocation3]  }
  0x11   :  { %272 = dma.done.wait [#allocation3], 256  }
  0x12   :  { %273 = vsyncadd [#allocation3], 4294967040  ;;  %v277_v0 = vmov 0   ;;  %v30_v1 = vld [vmem:[%s341_s0] sm:$0x3]  ;;  %v44_v5 = vlaneseq  ;;  %v31_v8 = vld [vmem:[#allocation2] sm:$0xff] }
  0x13   :  { %223 = vset.pattern.permute.xlu0 %v277_v0  ;;  %v90_v2 = vld [vmem:[%s342_s1] sm:$0x3]  ;;  %v278_v3 = vmov 1983009808   ;;  %v40_v11 = vcombine.high %v31_v8, %v31_v8  ;;  %v92_v13 = vld [vmem:[%s344_s3 + $0x8] sm:$0xff]  ;;  %s279_s1 = smov [#allocation5]  }
  0x14   :  { %35 = vperm.xlu0 %223, %v30_v1   ;;  %v42_v4 = vunpack.c.l.s4 %v278_v3  ;;  %v45_v7 = vshrl.u32 %v44_v5, 7  ;;  %v32_v9 = vld [vmem:[#allocation2 + $0x8] sm:$0xff]  ;;  %v117_v16 = vcombine.high %v92_v13, %v92_v13 }
  0x15   :  { %v91_v10 = vld [vmem:[%s344_s3] sm:$0xff]  ;;  %v57_v14 = vcombine.high %v32_v9, %v32_v9  ;;  %s210_s3 = sshll.u32 %s279_s1, 4  ;;  %s211_s3 = int_to_ptr.vmem [resolvable:$true] %s210_s3 }
  0x16   :  { %v43_v6 = vunpack.c.0.s8 %v42_v4  ;;  %v100_v15 = vcombine.high %v91_v10, %v91_v10  ;;  %s250_s7 = scalar_lea.vmem %s211_s3, 256  ;;  %p255_p9 = scmp.lt.s32.totalorder %s211_s3, %s211_s3 }
  0x17   :  { %p251_p8 = scmp.ne.s32.totalorder %s211_s3, %s250_s7  ;;  %p256_p10 = scmp.lt.s32.totalorder %s250_s7, %s250_s7 }
  0x18   :  { %95 = vperm.xlu0 %223, %v90_v2   ;;  %v46_v12 = vsub.s32 %v43_v6, %v45_v7 }
  0x19   :  { %p257_p11 = por %p256_p10, %p255_p9 }
  0x1a   :  { %v47_v17 = vrot.slane %v31_v8, %v46_v12  ;;  %v54_v18 = vrot.slane %v40_v11, %v46_v12  ;;  %v64_v19 = vrot.slane %v32_v9, %v46_v12  ;;  %v71_v20 = vrot.slane %v57_v14, %v46_v12 }
  0x1b   :  { %v107_v21 = vrot.slane %v91_v10, %v46_v12  ;;  %v114_v22 = vrot.slane %v100_v15, %v46_v12  ;;  %v124_v23 = vrot.slane %v92_v13, %v46_v12  ;;  %v131_v24 = vrot.slane %v117_v16, %v46_v12  ;;  %p258_p12 = pnand %p257_p11, %p251_p8 }
  0x1c   :  { %v55_v25 = vcombine.high %v47_v17, %v47_v17  ;;  %v56_v26 = vcombine.high %v54_v18, %v54_v18  ;;  %v72_v28 = vcombine.high %v64_v19, %v64_v19  ;;  %v73_v29 = vcombine.high %v71_v20, %v71_v20 }
  0x1d   :  { %v115_v30 = vcombine.high %v107_v21, %v107_v21  ;;  %v116_v31 = vcombine.high %v114_v22, %v114_v22  ;;  %v132_v32 = vcombine.high %v124_v23, %v124_v23  ;;  %v133_v33 = vcombine.high %v131_v24, %v131_v24 }
  0x93   :  { %v36_v27 = vpop.permute.xlu0 %35 }
  0x94   :  { %v82_v34 = vmul.f32 %v47_v17, %v36_v27  ;;  %v83_v35 = vmul.f32 %v55_v25, %v36_v27  ;;  %v84_v36 = vmul.f32 %v54_v18, %v36_v27  ;;  %v85_v37 = vmul.f32 %v56_v26, %v36_v27 }
  0x95   :  { %v86_v39 = vmul.f32 %v64_v19, %v36_v27  ;;  %v87_v40 = vmul.f32 %v72_v28, %v36_v27  ;;  %v88_v41 = vmul.f32 %v71_v20, %v36_v27  ;;  %v89_v42 = vmul.f32 %v73_v29, %v36_v27 }
  0x97   :  { %v96_v38 = vpop.permute.xlu0 %95 }
  0x98   :  { %v142_v43 = vmul.f32 %v107_v21, %v96_v38  ;;  %v143_v44 = vmul.f32 %v115_v30, %v96_v38  ;;  %v144_v45 = vmul.f32 %v114_v22, %v96_v38  ;;  %v145_v46 = vmul.f32 %v116_v31, %v96_v38 }
  0x99   :  { %v146_v47 = vmul.f32 %v124_v23, %v96_v38  ;;  %v147_v48 = vmul.f32 %v132_v32, %v96_v38  ;;  %v148_v49 = vmul.f32 %v131_v24, %v96_v38  ;;  %v149_v50 = vmul.f32 %v133_v33, %v96_v38 }
  0x9a   :  { %v150_v51 = vadd.f32 %v142_v43, %v82_v34  ;;  %v151_v52 = vadd.f32 %v143_v44, %v83_v35  ;;  %v152_v53 = vadd.f32 %v144_v45, %v84_v36  ;;  %v153_v54 = vadd.f32 %v145_v46, %v85_v37 }
  0x9b   :  { %v154_v55 = vadd.f32 %v146_v47, %v86_v39  ;;  %v155_v56 = vadd.f32 %v147_v48, %v87_v40  ;;  %v156_v57 = vadd.f32 %v148_v49, %v88_v41  ;;  %v157_v58 = vadd.f32 %v149_v50, %v89_v42 }
  0x9c   :  { %v166_v59 = vcombine.low %v150_v51, %v151_v52  ;;  %v167_v60 = vcombine.low %v152_v53, %v153_v54 }
  0x9d   :  { %v183_v61 = vcombine.low %v154_v55, %v155_v56  ;;  %v184_v62 = vcombine.low %v156_v57, %v157_v58 }
  0x9e   :  { %v174_v63 = vrot.slane %v166_v59, %v46_v12  ;;  %v181_v0 = vrot.slane %v167_v60, %v46_v12 }
  0x9f   :  { %v191_v1 = vrot.slane %v183_v61, %v46_v12  ;;  %v198_v2 = vrot.slane %v184_v62, %v46_v12 }
  0xa0   :  { %v182_v3 = vcombine.low %v174_v63, %v181_v0 }
  0xa1   :  { %v199_v4 = vcombine.low %v191_v1, %v198_v2 }
  0xa2   :  { %202 = vst [vmem:[#allocation5] sm:$0xff] %v182_v3 }
  0xa3   :  { %203 = vst [vmem:[#allocation5 + $0x8] sm:$0xff] %v199_v4 }
  0xa4   :  { %261 = shalt.err (!%p258_p12)
}
  0xa5   :  { %s262_s10 = scalar_lea.hbm %s345_s4, 256 }
  0xa6   :  { %p263_p13 = scmp.ne.s32.totalorder %s345_s4, %s262_s10  ;;  %p266_p0 = scmp.lt.u32.totalorder %s262_s10, %s345_s4 }
  0xa8   :  { %p268_p1 = pnand %p266_p0, %p263_p13 }
  0xaa   :  { %271 = shalt.err (!%p268_p1)
}
  0xab   :  { %213 = dma.vmem_to_hbm [thread:$0]  %s211_s3, 256, %s345_s4, [#allocation4]  }
  0xac   :  { %274 = dma.done.wait [#allocation4], 256  }
  0xad   :  { %275 = vsyncadd [#allocation4], 4294967040 }
  0xae   :  { %217 = vsyncpa [#allocation3], 1 }
  0xaf   :  { %218 = vsyncpa [#allocation4], 1 }

</bundles_post_ra>
